<compile_context>
chip_gen: v6e
topology: v6e:2x2x1
jax: 0.10.0
libtpu: 0.0.40
codegen_flags: <defaults>
</compile_context>

<pallas_src>
import functools

import jax
import jax.numpy as jnp
from jax.experimental import pallas as pl
from jax.experimental.pallas import tpu as pltpu

EPSILON = 1e-6
_LANE = 128


def _round_up(x, m):
    return -(-x // m) * m


def _accumulate(pred, tgt, inter_acc, sm_acc, oh_acc, valid=None):
    """Softmax over classes for one spatial tile + per-class partial sums."""
    num_classes, thw = pred.shape

    if valid is not None:
        # Ragged last tile: out-of-bounds lanes hold undefined VMEM data; zero
        # the logits there so Inf/NaN bit patterns cannot poison max/exp.
        pred = jnp.where(valid, pred, 0.0)

    m = jnp.max(pred, axis=0, keepdims=True)              # (1, THW)
    e = jnp.exp(pred - m)                                  # (C, THW)
    denom = jnp.sum(e, axis=0, keepdims=True)              # (1, THW), in [1, C]
    # EUP approximate reciprocal + one Newton-Raphson step: ~f32 accuracy while
    # keeping the divide off the VPU slot.
    r = pl.reciprocal(denom, approx=True)
    r = r * (2.0 - denom * r)
    sm = e * r                                             # (C, THW)

    # One-hot via iota compare; consumed through selects (no cast + multiply).
    class_ids = jax.lax.broadcasted_iota(jnp.int32, (num_classes, thw), 0)
    class_mask = class_ids == tgt                          # (C, THW) bool

    if valid is not None:
        sm = jnp.where(valid, sm, 0.0)                     # padded cols sum to 1 otherwise
        oh_mask = jnp.logical_and(class_mask, valid)       # padded label 0 aliases class 0
    else:
        oh_mask = class_mask

    inter_acc[...] += jnp.sum(jnp.where(class_mask, sm, 0.0), axis=1, keepdims=True)
    sm_acc[...] += jnp.sum(sm, axis=1, keepdims=True)
    oh_acc[...] += jnp.sum(jnp.where(oh_mask, 1.0, 0.0), axis=1, keepdims=True)


def _dice_kernel(pred_ref, tgt_ref, out_ref, inter_acc, sm_acc, oh_acc,
                 *, hw_actual, thw):
    # pred_ref:  (C, THW) f32   -- logits tile for one batch element
    # tgt_ref:   (1, THW) i32   -- labels tile for one batch element
    # out_ref:   (C, 1)   f32   -- per-class dice for this batch element
    # *_acc:     (C, 1)   f32   -- VMEM accumulators (persist across h steps)
    h = pl.program_id(1)
    last = pl.num_programs(1) - 1

    @pl.when(h == 0)
    def _():
        inter_acc[...] = jnp.zeros_like(inter_acc)
        sm_acc[...] = jnp.zeros_like(sm_acc)
        oh_acc[...] = jnp.zeros_like(oh_acc)

    pred = pred_ref[...]
    tgt = tgt_ref[...].astype(jnp.int32)

    if hw_actual % thw != 0:
        # Ragged final block: masked path only runs on the last step so the
        # steady state pays no iota/compare/select mask overhead.
        @pl.when(h < last)
        def _():
            _accumulate(pred, tgt, inter_acc, sm_acc, oh_acc)

        @pl.when(h == last)
        def _():
            lane = jax.lax.broadcasted_iota(jnp.int32, (1, thw), 1)
            valid = (h * thw + lane) < hw_actual
            _accumulate(pred, tgt, inter_acc, sm_acc, oh_acc, valid=valid)
    else:
        _accumulate(pred, tgt, inter_acc, sm_acc, oh_acc)

    @pl.when(h == last)
    def _():
        union = sm_acc[...] + oh_acc[...]
        out_ref[...] = (2.0 * inter_acc[...] + EPSILON) / (union + EPSILON)


def _pick_spatial_tile(C, HW):
    """Bytes-based tile: ~4 MB of logits per step, VMEM-budget bounded."""
    if HW <= _LANE:
        return HW                                  # full-extent block (allowed)
    c_sub = _round_up(C, 8)                        # VMEM pads classes to 8 sublanes
    target_bytes = 4 * 1024 * 1024                 # per-step logits target
    vmem_budget = 24 * 1024 * 1024                 # safe under v7x 64 MiB / 32 MiB limit
    # Per-lane VMEM cost: pred double-buffer + ~3 block-sized f32 temps
    # (e, sm, mask-sized intermediates) + int32 label tile (sublane-padded, x2).
    bytes_per_lane = (2 + 3) * c_sub * 4 + 2 * 8 * 4
    target_thw = (target_bytes // (c_sub * 4)) // _LANE * _LANE
    max_thw = (vmem_budget // bytes_per_lane) // _LANE * _LANE
    hw_floor = (HW // _LANE) * _LANE               # keep block <= array extent
    return max(_LANE, min(target_thw, max_thw, hw_floor))


def dice_loss(pred, target):
    """pred: (N, C, H, W) float32 logits; target: (N, H, W) int labels."""
    N, C, H, W = pred.shape
    HW = H * W

    thw = _pick_spatial_tile(C, HW)
    num_h = pl.cdiv(HW, thw)                       # ragged last block; no host pad

    pred_r = pred.reshape(N, C, HW)
    tgt_r = target.reshape(N, 1, HW).astype(jnp.int32)   # stream labels as int32

    kernel = functools.partial(_dice_kernel, hw_actual=HW, thw=thw)

    dice_nc = pl.pallas_call(
        kernel,
        out_shape=jax.ShapeDtypeStruct((N, C, 1), jnp.float32),
        grid_spec=pltpu.PrefetchScalarGridSpec(
            num_scalar_prefetch=0,
            grid=(N, num_h),
            in_specs=[
                pl.BlockSpec((pl.Squeezed(), C, thw), lambda b, h: (b, 0, h)),
                pl.BlockSpec((pl.Squeezed(), 1, thw), lambda b, h: (b, 0, h)),
            ],
            out_specs=pl.BlockSpec((pl.Squeezed(), C, 1), lambda b, h: (b, 0, 0)),
            scratch_shapes=[
                pltpu.VMEM((C, 1), jnp.float32),
                pltpu.VMEM((C, 1), jnp.float32),
                pltpu.VMEM((C, 1), jnp.float32),
            ],
        ),
        compiler_params=pltpu.CompilerParams(
            dimension_semantics=("parallel", "arbitrary"),
            vmem_limit_bytes=32 * 1024 * 1024,
        ),
    )(pred_r, tgt_r)

    # TODO(synk): for N == 1 on v7x (2 TensorCores), add a leading parallel grid
    # axis splitting HW into 2 super-chunks emitting partial (inter, sm, oh)
    # sums so both cores get work; ratio + mean then move to this epilogue.

    # Final scalar mean over all (batch, class) dice scores — trivial glue.
    return 1.0 - jnp.mean(dice_nc)


def dice_loss_ref(pred, target):
    """Pure-JAX reference matching the PyTorch module."""
    num_classes = pred.shape[1]
    onehot = jax.nn.one_hot(target, num_classes, dtype=jnp.float32)  # (N,H,W,C)
    onehot = jnp.transpose(onehot, (0, 3, 1, 2))                     # (N,C,H,W)
    sm = jax.nn.softmax(pred, axis=1)
    inter = jnp.sum(sm * onehot, axis=(2, 3))
    union = jnp.sum(sm, axis=(2, 3)) + jnp.sum(onehot, axis=(2, 3))
    dice = (2.0 * inter + EPSILON) / (union + EPSILON)
    return 1.0 - jnp.mean(dice)


if __name__ == "__main__":
    key = jax.random.PRNGKey(0)
    k1, k2 = jax.random.split(key)
    N, C, H, W = 2, 4, 16, 16
    pred = jax.random.normal(k1, (N, C, H, W), dtype=jnp.float32)
    target = jax.random.randint(k2, (N, H, W), 0, C, dtype=jnp.int32)

    loss = jax.block_until_ready(dice_loss(pred, target))
    ref = jax.block_until_ready(dice_loss_ref(pred, target))

    if not jnp.allclose(loss, ref, atol=1e-5, rtol=1e-4):
        raise AssertionError(f"mismatch: pallas={loss} ref={ref}")
    print("KERNEL_OK")
</pallas_src>

<mosaic_0001>
module attributes {stable_mosaic.version = 11 : i64} {
  func.func @_dice_kernel(%arg0: i32, %arg1: i32, %arg2: memref<1x4x256xf32, #tpu.memory_space<vmem>>, %arg3: memref<1x1x256xi32, #tpu.memory_space<vmem>>, %arg4: memref<1x4x1xf32, #tpu.memory_space<vmem>>, %arg5: memref<4x1xf32, #tpu.memory_space<vmem>>, %arg6: memref<4x1xf32, #tpu.memory_space<vmem>>, %arg7: memref<4x1xf32, #tpu.memory_space<vmem>>) attributes {dimension_semantics = [#tpu.dimension_semantics<parallel>, #tpu.dimension_semantics<arbitrary>], iteration_bounds = array<i64: 2, 1>, scalar_prefetch = 0 : i64, scratch_operands = 3 : i64, tpu.core_type = #tpu.core_type<tc>, window_params = [{transform_indices = @transform_0, window_bounds = array<i64: 1, 4, 256>}, {transform_indices = @transform_1, window_bounds = array<i64: 1, 1, 256>}, {transform_indices = @transform_2, window_bounds = array<i64: 1, 4, 1>}]} {
    %c0_i32 = arith.constant 0 : i32
    %0 = arith.cmpi eq, %arg1, %c0_i32 : i32
    %1 = arith.extui %0 : i1 to i32
    %c0_i32_0 = arith.constant 0 : i32
    %2 = arith.cmpi ne, %1, %c0_i32_0 : i32
    scf.if %2 {
      %cst_28 = arith.constant 0.000000e+00 : f32
      %47 = vector.broadcast %cst_28 : f32 to vector<4x1xf32>
      %c0_29 = arith.constant 0 : index
      %c0_30 = arith.constant 0 : index
      %48 = vector.load %arg5[%c0_29, %c0_30] : memref<4x1xf32, #tpu.memory_space<vmem>>, vector<4x1xf32>
      tpu.vector_store %arg5[%c0_29, %c0_30], %47 {strides = array<i32>} : memref<4x1xf32, #tpu.memory_space<vmem>>, vector<4x1xf32>,
      %cst_31 = arith.constant 0.000000e+00 : f32
      %49 = vector.broadcast %cst_31 : f32 to vector<4x1xf32>
      %c0_32 = arith.constant 0 : index
      %c0_33 = arith.constant 0 : index
      %50 = vector.load %arg6[%c0_32, %c0_33] : memref<4x1xf32, #tpu.memory_space<vmem>>, vector<4x1xf32>
      tpu.vector_store %arg6[%c0_32, %c0_33], %49 {strides = array<i32>} : memref<4x1xf32, #tpu.memory_space<vmem>>, vector<4x1xf32>,
      %cst_34 = arith.constant 0.000000e+00 : f32
      %51 = vector.broadcast %cst_34 : f32 to vector<4x1xf32>
      %c0_35 = arith.constant 0 : index
      %c0_36 = arith.constant 0 : index
      %52 = vector.load %arg7[%c0_35, %c0_36] : memref<4x1xf32, #tpu.memory_space<vmem>>, vector<4x1xf32>
      tpu.vector_store %arg7[%c0_35, %c0_36], %51 {strides = array<i32>} : memref<4x1xf32, #tpu.memory_space<vmem>>, vector<4x1xf32>,
    } else {
    }
    %c0 = arith.constant 0 : index
    %c0_1 = arith.constant 0 : index
    %c0_2 = arith.constant 0 : index
    %3 = vector.load %arg2[%c0, %c0_1, %c0_2] : memref<1x4x256xf32, #tpu.memory_space<vmem>>, vector<1x4x256xf32>
    %4 = vector.shape_cast %3 : vector<1x4x256xf32> to vector<4x256xf32>
    %c0_3 = arith.constant 0 : index
    %c0_4 = arith.constant 0 : index
    %c0_5 = arith.constant 0 : index
    %5 = vector.load %arg3[%c0_3, %c0_4, %c0_5] : memref<1x1x256xi32, #tpu.memory_space<vmem>>, vector<1x1x256xi32>
    %6 = vector.shape_cast %5 : vector<1x1x256xi32> to vector<1x256xi32>
    %cst = arith.constant dense<0xFF800000> : vector<256xf32>
    %7 = vector.multi_reduction <maximumf>, %4, %cst [0] : vector<4x256xf32> to vector<256xf32>
    %8 = vector.shape_cast %7 : vector<256xf32> to vector<1x256xf32>
    %9 = vector.broadcast %8 : vector<1x256xf32> to vector<4x256xf32>
    %10 = arith.subf %4, %9 : vector<4x256xf32>
    %11 = math.exp %10 : vector<4x256xf32>
    %cst_6 = arith.constant dense<0.000000e+00> : vector<256xf32>
    %12 = vector.multi_reduction <add>, %11, %cst_6 [0] : vector<4x256xf32> to vector<256xf32>
    %13 = vector.shape_cast %12 : vector<256xf32> to vector<1x256xf32>
    %14 = tpu.reciprocal %13 {approx = true} : vector<1x256xf32> -> vector<1x256xf32>
    %15 = arith.mulf %13, %14 : vector<1x256xf32>
    %cst_7 = arith.constant 2.000000e+00 : f32
    %16 = vector.broadcast %cst_7 : f32 to vector<1x256xf32>
    %17 = arith.subf %16, %15 : vector<1x256xf32>
    %18 = arith.mulf %14, %17 : vector<1x256xf32>
    %19 = vector.broadcast %18 : vector<1x256xf32> to vector<4x256xf32>
    %20 = arith.mulf %11, %19 : vector<4x256xf32>
    %21 = tpu.iota {dimensions = array<i32: 0>} : vector<4x256xi32>
    %22 = vector.broadcast %6 : vector<1x256xi32> to vector<4x256xi32>
    %23 = arith.cmpi eq, %21, %22 : vector<4x256xi32>
    %c0_8 = arith.constant 0 : index
    %c0_9 = arith.constant 0 : index
    %24 = vector.load %arg5[%c0_8, %c0_9] : memref<4x1xf32, #tpu.memory_space<vmem>>, vector<4x1xf32>
    %cst_10 = arith.constant 0.000000e+00 : f32
    %25 = vector.broadcast %cst_10 : f32 to vector<4x256xf32>
    %26 = arith.select %23, %20, %25 : vector<4x256xi1>, vector<4x256xf32>
    %cst_11 = arith.constant dense<0.000000e+00> : vector<4xf32>
    %27 = vector.multi_reduction <add>, %26, %cst_11 [1] : vector<4x256xf32> to vector<4xf32>
    %28 = vector.shape_cast %27 : vector<4xf32> to vector<4x1xf32>
    %29 = arith.addf %24, %28 : vector<4x1xf32>
    %c0_12 = arith.constant 0 : index
    %c0_13 = arith.constant 0 : index
    %30 = vector.load %arg5[%c0_12, %c0_13] : memref<4x1xf32, #tpu.memory_space<vmem>>, vector<4x1xf32>
    tpu.vector_store %arg5[%c0_12, %c0_13], %29 {strides = array<i32>} : memref<4x1xf32, #tpu.memory_space<vmem>>, vector<4x1xf32>,
    %c0_14 = arith.constant 0 : index
    %c0_15 = arith.constant 0 : index
    %31 = vector.load %arg6[%c0_14, %c0_15] : memref<4x1xf32, #tpu.memory_space<vmem>>, vector<4x1xf32>
    %cst_16 = arith.constant dense<0.000000e+00> : vector<4xf32>
    %32 = vector.multi_reduction <add>, %20, %cst_16 [1] : vector<4x256xf32> to vector<4xf32>
    %33 = vector.shape_cast %32 : vector<4xf32> to vector<4x1xf32>
    %34 = arith.addf %31, %33 : vector<4x1xf32>
    %c0_17 = arith.constant 0 : index
    %c0_18 = arith.constant 0 : index
    %35 = vector.load %arg6[%c0_17, %c0_18] : memref<4x1xf32, #tpu.memory_space<vmem>>, vector<4x1xf32>
    tpu.vector_store %arg6[%c0_17, %c0_18], %34 {strides = array<i32>} : memref<4x1xf32, #tpu.memory_space<vmem>>, vector<4x1xf32>,
    %c0_19 = arith.constant 0 : index
    %c0_20 = arith.constant 0 : index
    %36 = vector.load %arg7[%c0_19, %c0_20] : memref<4x1xf32, #tpu.memory_space<vmem>>, vector<4x1xf32>
    %cst_21 = arith.constant 1.000000e+00 : f32
    %cst_22 = arith.constant 0.000000e+00 : f32
    %37 = vector.broadcast %cst_21 : f32 to vector<4x256xf32>
    %38 = vector.broadcast %cst_22 : f32 to vector<4x256xf32>
    %39 = arith.select %23, %37, %38 : vector<4x256xi1>, vector<4x256xf32>
    %cst_23 = arith.constant dense<0.000000e+00> : vector<4xf32>
    %40 = vector.multi_reduction <add>, %39, %cst_23 [1] : vector<4x256xf32> to vector<4xf32>
    %41 = vector.shape_cast %40 : vector<4xf32> to vector<4x1xf32>
    %42 = arith.addf %36, %41 : vector<4x1xf32>
    %c0_24 = arith.constant 0 : index
    %c0_25 = arith.constant 0 : index
    %43 = vector.load %arg7[%c0_24, %c0_25] : memref<4x1xf32, #tpu.memory_space<vmem>>, vector<4x1xf32>
    tpu.vector_store %arg7[%c0_24, %c0_25], %42 {strides = array<i32>} : memref<4x1xf32, #tpu.memory_space<vmem>>, vector<4x1xf32>,
    %c0_i32_26 = arith.constant 0 : i32
    %44 = arith.cmpi eq, %arg1, %c0_i32_26 : i32
    %45 = arith.extui %44 : i1 to i32
    %c0_i32_27 = arith.constant 0 : i32
    %46 = arith.cmpi ne, %45, %c0_i32_27 : i32
    scf.if %46 {
      %c0_28 = arith.constant 0 : index
      %c0_29 = arith.constant 0 : index
      %47 = vector.load %arg6[%c0_28, %c0_29] : memref<4x1xf32, #tpu.memory_space<vmem>>, vector<4x1xf32>
      %c0_30 = arith.constant 0 : index
      %c0_31 = arith.constant 0 : index
      %48 = vector.load %arg7[%c0_30, %c0_31] : memref<4x1xf32, #tpu.memory_space<vmem>>, vector<4x1xf32>
      %49 = arith.addf %47, %48 : vector<4x1xf32>
      %c0_32 = arith.constant 0 : index
      %c0_33 = arith.constant 0 : index
      %50 = vector.load %arg5[%c0_32, %c0_33] : memref<4x1xf32, #tpu.memory_space<vmem>>, vector<4x1xf32>
      %cst_34 = arith.constant 2.000000e+00 : f32
      %51 = vector.broadcast %cst_34 : f32 to vector<4x1xf32>
      %52 = arith.mulf %51, %50 : vector<4x1xf32>
      %cst_35 = arith.constant 9.99999997E-7 : f32
      %53 = vector.broadcast %cst_35 : f32 to vector<4x1xf32>
      %54 = arith.addf %52, %53 : vector<4x1xf32>
      %cst_36 = arith.constant 9.99999997E-7 : f32
      %55 = vector.broadcast %cst_36 : f32 to vector<4x1xf32>
      %56 = arith.addf %49, %55 : vector<4x1xf32>
      %57 = arith.divf %54, %56 : vector<4x1xf32>
      %c0_37 = arith.constant 0 : index
      %c0_38 = arith.constant 0 : index
      %c0_39 = arith.constant 0 : index
      %58 = vector.load %arg4[%c0_37, %c0_38, %c0_39] : memref<1x4x1xf32, #tpu.memory_space<vmem>>, vector<1x4x1xf32>
      %59 = vector.shape_cast %58 : vector<1x4x1xf32> to vector<4x1xf32>
      %60 = vector.shape_cast %57 : vector<4x1xf32> to vector<1x4x1xf32>
      tpu.vector_store %arg4[%c0_37, %c0_38, %c0_39], %60 {strides = array<i32>} : memref<1x4x1xf32, #tpu.memory_space<vmem>>, vector<1x4x1xf32>,
    } else {
    }
    return
  }
  func.func @transform_0(%arg0: i32, %arg1: i32) -> (i32, i32, i32) {
    %c0_i32 = arith.constant 0 : i32
    %c0_i32_0 = arith.constant 0 : i32
    return %arg0, %c0_i32, %arg1 : i32, i32, i32
  }
  func.func @transform_1(%arg0: i32, %arg1: i32) -> (i32, i32, i32) {
    %c0_i32 = arith.constant 0 : i32
    %c0_i32_0 = arith.constant 0 : i32
    return %arg0, %c0_i32, %arg1 : i32, i32, i32
  }
  func.func @transform_2(%arg0: i32, %arg1: i32) -> (i32, i32, i32) {
    %c0_i32 = arith.constant 0 : i32
    %c0_i32_0 = arith.constant 0 : i32
    %c0_i32_1 = arith.constant 0 : i32
    return %arg0, %c0_i32, %c0_i32_0 : i32, i32, i32
  }
}

</mosaic_0001>

<bundles_post_ra>
// kernel: tpu_custom_call.1
= control target key start
LH: loop header
LB: loop body
LE: loop exit
PB: predicated region body
PF: predicated region fallthrough
CT: control target
= control target key end

     0   :  { %7 = vsyncpa [#allocation6], 0  ;;  %s815_s0 = inlined_call_operand.hbm [shape: f32[2,4,256], index: 0, kind: input, shape index: {}]   ;;  %s816_s1 = inlined_call_operand.hbm [shape: s32[2,1,256], index: 1, kind: input, shape index: {}]   ;;  %s817_s2 = inlined_call_operand.vmem [shape: f32[2,4,1], index: 2, kind: output, shape index: {}]  }
   0x1   :  { %9 = vsyncpa [#allocation6 + $0x1], 0 }
   0x2   :  { %10 = vsyncpa [#allocation8], 0 }
   0x3   :  { %12 = vsyncpa [#allocation8 + $0x1], 0  ;;  %s662_s9 = smov 0   ;;  %s664_s10 = smov 0  }
   0x4   :  { %s666_s11 = smov 0   ;;  %s668_s12 = smov 0  }
   0x5   :  { %s670_s13 = smov 0   ;;  %s672_s14 = smov 0  }
   0x6 LB: > { %s444_s15 = sadd.s32 4294967295, %s642_s14   ;;  %s30_s16 = sadd.s32 1, %s638_s13  ;;  %s642_s14 = sphi %s672_s14, %s18_s14   ;;  %s638_s13 = sphi %s670_s13, %s826_s13   ;;  %s634_s12 = sphi %s668_s12, %s825_s12   ;;  %s630_s11 = sphi %s666_s11, %s824_s11   ;;  %s626_s10 = sphi %s664_s10, %s823_s10   ;;  %s622_s9 = sphi %s662_s9, %s822_s9  }
   0x7   : > { %p32_p0 = scmp.ge.s32.totalorder %s30_s16, 2  ;;  %s39_s17 = sadd.s32 1, %s630_s11 }
   0x8   : > { %p46_p1 = scmp.ne.s32.totalorder %s630_s11, %s626_s10  ;;  %p47_p2 = scmp.eq.s32.totalorder %s642_s14, 0 }
   0x9   : > { %s828_s16 = smov (%p32_p0, %s30_s16), 0  ;;  %p52_p4 = scmp.ne.s32.totalorder %s626_s10, %s622_s9 }
   0xa   : > { %p698_p3 = por %p47_p2, %p46_p1  ;;  %s34_s19 = ssub.s32 %s638_s13, %s828_s16 }
   0xb   : > { %p53_p5 = scmp.eq.s32.totalorder %s444_s15, 0  ;;  %p37_p6 = scmp.eq.s32.totalorder %s34_s19, 0 }
   0xc   : > { %p473_p8 = scmp.lt.s32.totalorder %s642_s14, 2  ;;  %s714_s22 = sand.u32 1, %s630_s11  }
   0xd   : > { %p705_p7 = por %p53_p5, %p52_p4  ;;  %s460_s23 = sshll.u32 %s638_s13, 7 }
   0xe   : > { %s711_s21 = scalar_select %p37_p6, %s630_s11, %s39_s17  }
   0xf   : > { %s448_s24 = sshll.u32 %s714_s22, 3  ;;  %s142_s27 = scalar_lea.hbm %s815_s0, %s460_s23 }
  0x10   : > { %s134_s28 = scalar_lea.vmem [#allocation5], %s448_s24  ;;  %p723_p9 = pnand %p473_p8, %p698_p3 }
  0x11   : > { %s144_s29 = sshll.u32 %s134_s28, 4  ;;  %p454_p10 = scmp.ge.s32.totalorder %s642_s14, 1  ;;  %s145_s29 = int_to_ptr.vmem [resolvable:$true] %s144_s29 }
  0x12   : > { %p170_p11 = scmp.lt.s32.totalorder %s642_s14, 3  ;;  %s131_s3 = scalar_lea.sflag [#allocation6], %s714_s22 }
  0x13   : > { %p534_p12 = pneg %p723_p9  ;;  %s545_s4 = scalar_lea.vmem %s145_s29, 128 }
  0x14   : > { %p546_p13 = scmp.ne.s32.totalorder %s145_s29, %s545_s4  ;;  %s644_s5 = smov [#allocation5]  }
  0x15   : > { %s550_s6 = sshll.u32 %s644_s5, 4  ;;  %s551_s6 = int_to_ptr.vmem [resolvable:$false] %s550_s6 }
  0x16   : > { %p548_p0 = pnand %p546_p13, %p534_p12  ;;  %s552_s7 = scalar_lea.vmem %s551_s6, 256 }
  0x17   : > { %p553_p2 = scmp.lt.s32.totalorder %s145_s29, %s551_s6  ;;  %p554_p3 = scmp.lt.s32.totalorder %s552_s7, %s545_s4 }
  0x18   : > { %p549_p1 = pneg %p548_p0 }
  0x19   : > { %p555_p4 = por %p554_p3, %p553_p2 }
  0x1b   : > { %p556_p5 = pnand %p555_p4, %p549_p1 }
  0x1d   : > { %559 = shalt.err (!%p556_p5)
}
  0x1e   : > { %469 = dma.hbm_to_vmem [thread:$0]  (!%p723_p9), %s142_s27, 128, %s145_s29, %s131_s3  }
  0x1f   : > { %p741_p6 = pnand %p454_p10, %p170_p11  ;;  %s451_s9 = sshll.u32 %s714_s22, 1 }
  0x20   : > { %s461_s15 = sshll.u32 %s638_s13, 5  ;;  %s155_s23 = scalar_lea.vmem [#allocation7], %s451_s9 }
  0x21   : > { %s163_s19 = scalar_lea.hbm %s816_s1, %s461_s15  ;;  %s165_s24 = sshll.u32 %s155_s23, 4  ;;  %s166_s24 = int_to_ptr.vmem [resolvable:$true] %s165_s24 }
  0x22   : > { %s152_s25 = scalar_lea.sflag [#allocation8], %s714_s22  ;;  %s573_s26 = scalar_lea.vmem %s166_s24, 32 }
  0x23   : > { %p574_p8 = scmp.ne.s32.totalorder %s166_s24, %s573_s26  ;;  %s645_s27 = smov [#allocation7]  }
  0x24   : > { %s578_s28 = sshll.u32 %s645_s27, 4  ;;  %s579_s28 = int_to_ptr.vmem [resolvable:$false] %s578_s28 }
  0x25   : > { %p576_p13 = pnand %p574_p8, %p534_p12  ;;  %s580_s29 = scalar_lea.vmem %s579_s28, 64 }
  0x26   : > { %p581_p10 = scmp.lt.s32.totalorder %s166_s24, %s579_s28  ;;  %p582_p11 = scmp.lt.s32.totalorder %s580_s29, %s573_s26 }
  0x27   : > { %p577_p0 = pneg %p576_p13 }
  0x28   : > { %p583_p1 = por %p582_p11, %p581_p10 }
  0x2a   : > { %p584_p2 = pnand %p583_p1, %p577_p0 }
  0x2c   : > { %587 = shalt.err (!%p584_p2)
}
  0x2d   : > { %472 = dma.hbm_to_vmem [thread:$0]  (!%p723_p9), %s163_s19, 32, %s166_s24, %s152_s25  }
  0x2e   : > { %174 = sbr.rel (%p741_p6) target bundleno = 308 (0x134), region = 28  ;;  %s176_s22 = sand.u32 (!%p741_p6), 1, %s626_s10  }
  0x2f   : > { %s455_s3 = sshll.u32 (!%p741_p6), %s176_s22, 3  ;;  %s177_s4 = scalar_lea.sflag (!%p741_p6), [#allocation6], %s176_s22 }
  0x30   : > { %s180_s5 = scalar_lea.vmem (!%p741_p6), [#allocation5], %s455_s3 }
  0x33   : > { %613 = dma.done.wait (%p705_p7), %s177_s4, 128  }
  0x34   : > { %615 = vsyncadd (%p705_p7), %s177_s4, 4294967168  ;;  %s456_s6 = sshll.u32 %s176_s22, 1  ;;  %s186_s7 = scalar_lea.sflag [#allocation8], %s176_s22 }
  0x35   : > { %s763_s9 = scalar_lea.vmem [#allocation7], %s456_s6 }
  0x36   : > { %617 = dma.done.wait (%p705_p7), %s186_s7, 32  }
  0x37   : > { %619 = vsyncadd (%p705_p7), %s186_s7, 4294967264  ;;  %vm224_vm0 = vcmask 3072   ;;  %v646_v0 = vmov 0.0   ;;  %vm233_vm1 = vcmask 1043456   ;;  %v228_v1 = vld [vmem:[%s180_s5] sm:$0xff]  ;;  %v285_v36 = vlaneseq  ;;  %p216_p7 = scmp.lt.s32.totalorder %s634_s12, 1 }
  0x38   : > { %226 = vst.msk [vmem:[#allocation3] sm:$0xf] %vm224_vm0, %v646_v0  ;;  %225 = vst.msk [vmem:[#allocation2] sm:$0xf] %vm224_vm0, %v646_v0  ;;  %v231_v2 = vcombine.high %v228_v1, %v228_v1  ;;  %v234_v3 = vsel %vm233_vm1, %v228_v1, -inf }
  0x39   : > { %227 = vst.msk [vmem:[#allocation4] sm:$0xf] %vm224_vm0, %v646_v0  ;;  %v235_v4 = vrot.slane %v234_v3, 4  ;;  %v286_v37 = vshrl.u32 %v285_v36, 7  ;;  %v229_v43 = vld [vmem:[%s763_s9] sm:$0x3] }
  0x3a   : > { %v241_v5 = vsel %vm233_vm1, %v231_v2, -inf  ;;  %s830_s12 = smov (!%p216_p7, %s634_s12), 1 }
  0x3b   : > { %v236_v6 = vmax.f32 %v234_v3, %v235_v4  ;;  %v242_v7 = vrot.slane %v241_v5, 4  ;;  %v289_v40 = vsub.s32 0, %v286_v37  ;;  %v293_v41 = vsub.s32 1, %v286_v37  ;;  %s457_s20 = sshll.u32 %s830_s12, 2 }
  0x3c   : > { %s219_s15 = scalar_lea.vmem %s817_s2, %s457_s20 }
  0x3d   : > { %v237_v8 = vrot.slane %v236_v6, 2  ;;  %v243_v9 = vmax.f32 %v241_v5, %v242_v7  ;;  %v290_v48 = vrot.slane %v229_v43, %v289_v40  ;;  %v294_v49 = vrot.slane %v229_v43, %v293_v41 }
  0x3f   : > { %v238_v10 = vmax.f32 %v236_v6, %v237_v8  ;;  %v244_v11 = vrot.slane %v243_v9, 2  ;;  %vm295_vm2 = vcmp.eq.s32.totalorder %v286_v37, %v290_v48  ;;  %vm296_vm3 = vcmp.eq.s32.totalorder %v286_v37, %v294_v49  ;;  %v297_v4 = vld [vmem:[#allocation2] sm:$0xf] }
  0x40   : > { %v320_v53 = vsel %vm295_vm2, 1.0, %v646_v0  ;;  %v321_v54 = vsel %vm296_vm3, 1.0, %v646_v0  ;;  %v311_v0 = vld [vmem:[#allocation3] sm:$0xf]  ;;  %v319_v8 = vld [vmem:[#allocation4] sm:$0xf] }
  0x41   : > { %v239_v12 = vrot.slane %v238_v10, 1  ;;  %v245_v13 = vmax.f32 %v243_v9, %v244_v11  ;;  %v322_v60 = vsel %vm233_vm1, %v320_v53, 0.0  ;;  %v323_v61 = vsel %vm233_vm1, %v321_v54, 0.0 }
  0x42   : > { %v324_v3 = vadd.f32 %v323_v61, %v322_v60 }
  0x43   : > { %v240_v14 = vmax.f32 %v238_v10, %v239_v12  ;;  %v246_v15 = vrot.slane %v245_v13, 1 }
  0x45   : > { %v247_v16 = vmax.f32 %v245_v13, %v246_v15 }
  0x47   : > { %v250_v17 = vcombine.low %v240_v14, %v247_v16 }
  0x49   : > { %v252_v18 = vsub.f32 %v228_v1, %v250_v17 }
  0x4b   : > { %v253_v19 = vmul.f32 1.442695, %v252_v18 }
  0x4d   : > { %524 = vpow2.f32 %v253_v19 }
  0x5a   : > { %v525_v20 = vpop.eup %524 }
  0x5b   : > { %v256_v21 = vcombine.high %v525_v20, %v525_v20  ;;  %v258_v22 = vsel %vm233_vm1, %v525_v20, 0.0 }
  0x5c   : > { %v259_v23 = vrot.slane %v258_v22, 4 }
  0x5d   : > { %v265_v24 = vsel %vm233_vm1, %v256_v21, 0.0 }
  0x5e   : > { %v260_v25 = vadd.f32 %v259_v23, %v258_v22  ;;  %v266_v26 = vrot.slane %v265_v24, 4 }
  0x60   : > { %v261_v27 = vrot.slane %v260_v25, 2  ;;  %v267_v28 = vadd.f32 %v266_v26, %v265_v24 }
  0x62   : > { %v262_v29 = vadd.f32 %v261_v27, %v260_v25  ;;  %v268_v30 = vrot.slane %v267_v28, 2 }
  0x64   : > { %v263_v31 = vrot.slane %v262_v29, 1  ;;  %v269_v32 = vadd.f32 %v268_v30, %v267_v28 }
  0x66   : > { %v264_v33 = vadd.f32 %v263_v31, %v262_v29  ;;  %v270_v34 = vrot.slane %v269_v32, 1 }
  0x68   : > { %v271_v35 = vadd.f32 %v270_v34, %v269_v32  ;;  %526 = vrcp.f32 %v264_v33 }
  0x6a   : > { %528 = vrcp.f32 %v271_v35 }
  0x75   : > { %v527_v38 = vpop.eup %526 }
  0x76   : > { %v274_v39 = vmul.f32 %v527_v38, %v264_v33 }
  0x77   : > { %v529_v42 = vpop.eup %528 }
  0x78   : > { %v275_v44 = vmul.f32 %v529_v42, %v271_v35  ;;  %v276_v45 = vsub.f32 2.0, %v274_v39 }
  0x7a   : > { %v277_v46 = vsub.f32 2.0, %v275_v44  ;;  %v278_v47 = vmul.f32 %v527_v38, %v276_v45 }
  0x7c   : > { %v279_v50 = vmul.f32 %v529_v42, %v277_v46 }
  0x7e   : > { %v282_v51 = vcombine.low %v278_v47, %v279_v50 }
  0x80   : > { %v284_v52 = vmul.f32 %v525_v20, %v282_v51 }
  0x82   : > { %v299_v55 = vcombine.high %v284_v52, %v284_v52  ;;  %v312_v56 = vsel %vm233_vm1, %v284_v52, 0.0  ;;  %v301_v57 = vsel %vm295_vm2, %v284_v52, 0.0 }
  0x83   : > { %v303_v58 = vsel %vm233_vm1, %v301_v57, 0.0 }
  0x84   : > { %v313_v59 = vsel %vm233_vm1, %v299_v55, 0.0  ;;  %v302_v62 = vsel %vm296_vm3, %v299_v55, 0.0 }
  0x85   : > { %v314_v63 = vadd.f32 %v313_v59, %v312_v56  ;;  %v304_v1 = vsel %vm233_vm1, %v302_v62, 0.0 }
  0x86   : > { %v305_v2 = vadd.f32 %v304_v1, %v303_v58 }
  0x87   : > { %315 = vadd.xlane.f32.xlu0 %v314_v63 }
  0x88   : > { %306 = vadd.xlane.f32.xlu1 %v305_v2 }
  0x8b   : > { %325 = vadd.xlane.f32.xlu0 %v324_v3 }
 0x110   : > { %v316_v5 = vpop.xlane.xlu0 %315 }
 0x111   : > { %v317_v6 = vadd.f32 %v316_v5, %v311_v0  ;;  %v307_v7 = vpop.xlane.xlu1 %306 }
 0x112   : > { %v308_v9 = vadd.f32 %v307_v7, %v297_v4 }
 0x113   : > { %318 = vst.msk [vmem:[#allocation3] sm:$0xf] %vm224_vm0, %v317_v6 }
 0x114   : > { %v326_v10 = vpop.xlane.xlu0 %325  ;;  %310 = vst.msk [vmem:[#allocation2] sm:$0xf] %vm224_vm0, %v308_v9 }
 0x115   : > { %v327_v11 = vadd.f32 %v326_v10, %v319_v8 }
 0x117   : > { %328 = vst.msk [vmem:[#allocation4] sm:$0xf] %vm224_vm0, %v327_v11 }
 0x11a   : > { %v332_v12 = vld [vmem:[#allocation3] sm:$0xf] }
 0x11b   : > { %v335_v16 = vld [vmem:[#allocation2] sm:$0xf] }
 0x11c   : > { %v336_v17 = vmul.f32 2.0, %v335_v16 }
 0x11e   : > { %v333_v13 = vld [vmem:[#allocation4] sm:$0xf]  ;;  %v337_v18 = vadd.f32 1e-06, %v336_v17 }
 0x11f   : > { %v334_v14 = vadd.f32 %v333_v13, %v332_v12 }
 0x121   : > { %v338_v15 = vadd.f32 1e-06, %v334_v14 }
 0x123   : > { %530 = vrcp.f32 %v338_v15 }
 0x130   : > { %v531_v19 = vpop.eup %530 }
 0x131   : > { %v340_v20 = vmul.f32 %v531_v19, %v337_v18 }
 0x133   : > { %341 = vst.msk [vmem:[%s219_s15] sm:$0xf] %vm224_vm0, %v340_v20 }
 0x134 PF: > { %s18_s14 = sadd.s32 1, %s642_s14   ;;  %s822_s9 = smov %s626_s10 }
 0x135   : > { %p15_p9 = scmp.ge.s32.totalorder %s18_s14, 4   ;;  %s823_s10 = smov %s630_s11 }
 0x136   : > { %s824_s11 = smov %s711_s21  ;;  %s825_s12 = smov %s638_s13 }
 0x137   : > { %s826_s13 = smov %s828_s16  ;;  %17 = sbr.rel (!%p15_p9) target bundleno = 6 (0x6), region = 89 }
 0x13c   :  { %361 = vsyncpa [#allocation6], 1 }
 0x13d   :  { %363 = vsyncpa [#allocation6 + $0x1], 1 }
 0x13e   :  { %364 = vsyncpa [#allocation8], 1 }
 0x13f   :  { %366 = vsyncpa [#allocation8 + $0x1], 1 }

</bundles_post_ra>
